<compile_context>
chip_gen: v6e
topology: v6e:2x2x1
jax: 0.10.0
libtpu: 0.0.40
codegen_flags: <defaults>
</compile_context>

<pallas_src>
import functools

import jax
import jax.numpy as jnp
import numpy as np
from jax import lax
from jax.experimental import pallas as pl
from jax.experimental.pallas import tpu as pltpu

_GUARD = 128  # zero/ignored guard lanes on each side of the batch-folded slab


def _rup(v, m):
    return ((v + m - 1) // m) * m


# ----------------------------------------------------------------------------
# Kernel builder: closes over all static polyphase metadata.
# ----------------------------------------------------------------------------
def _make_kernel(S, K, taps_t, pad_c, guard, nbw, ct_p, ctcf_p, c1_p, c2_p):
    f32 = jnp.float32
    bf16 = jnp.bfloat16

    def kernel(x_ref, fph_ref, mask_ref, wt_ref, bt_ref, w1_ref, b1_ref,
               w2_ref, b2_ref, out_ref, *scratch):
        # x_ref   : (Cin_p, guard + nbw + guard)      bf16, batch-folded slab
        # fph_ref : (S, Cf_p, guard + nbw + guard)    bf16, phase-split skip
        # mask_ref: (S, 1, nbw)                       f32, 1 on valid columns
        # wt_ref  : (K, Ct_p, Cin_p)   w1_ref: (K, C1_p, Ct_p+Cf_p)
        # w2_ref  : (K, C2_p, C1_p)    b*_ref: (C, 1)
        # out_ref : (S, C2_p, nbw)                    f32, phase-major slabs
        ycat = scratch[:S]           # S refs, (Ct_p+Cf_p, guard+nbw+guard) bf16
        hsc = scratch[S:]            # S refs, (C1_p,      guard+nbw+guard) bf16

        # Hoisted bias broadcasts (one per stage, reused across all phases).
        bt_full = jnp.broadcast_to(bt_ref[...], (ct_p, nbw))
        b1_full = jnp.broadcast_to(b1_ref[...], (c1_p, nbw))
        b2_full = jnp.broadcast_to(b2_ref[...], (c2_p, nbw))

        # Validity masks (per output phase).  Select, don't multiply, so any
        # stale garbage read from the uninitialized guard lanes cannot poison
        # valid columns (even if it happens to be NaN/Inf).
        masks = [mask_ref[p] > 0.5 for p in range(S)]

        # ---- Stage 1: ConvTranspose1d (polyphase) + channel concat in VMEM.
        xv = {}
        for p in range(S):
            for (_, d) in taps_t[p]:
                if d not in xv:
                    xv[d] = x_ref[:, guard + d:guard + d + nbw]
        for p in range(S):
            acc = bt_full
            for (k, d) in taps_t[p]:
                acc = acc + jnp.dot(wt_ref[k], xv[d],
                                    preferred_element_type=f32)
            y = jnp.where(masks[p], acc, 0.0)
            ycat[p][0:ct_p, guard:guard + nbw] = y.astype(bf16)
            ycat[p][ct_p:ctcf_p, :] = fph_ref[p]       # skip-connection rows

        # ---- Stage 2: Conv1d #1 ('same') over concat([y, f]) + ReLU.
        yv = {}
        for p in range(S):
            for k in range(K):
                sh, q = divmod(p + k - pad_c, S)
                if (q, sh) not in yv:
                    yv[(q, sh)] = ycat[q][:, guard + sh:guard + sh + nbw]
        for p in range(S):
            acc = b1_full
            for k in range(K):
                sh, q = divmod(p + k - pad_c, S)
                acc = acc + jnp.dot(w1_ref[k], yv[(q, sh)],
                                    preferred_element_type=f32)
            h = jnp.where(masks[p], jnp.maximum(acc, 0.0), 0.0)
            hsc[p][:, guard:guard + nbw] = h.astype(bf16)

        # ---- Stage 3: Conv1d #2 ('same') + ReLU -> phase-major output slabs.
        hv = {}
        for p in range(S):
            for k in range(K):
                sh, q = divmod(p + k - pad_c, S)
                if (q, sh) not in hv:
                    hv[(q, sh)] = hsc[q][:, guard + sh:guard + sh + nbw]
        for p in range(S):
            acc = b2_full
            for k in range(K):
                sh, q = divmod(p + k - pad_c, S)
                acc = acc + jnp.dot(w2_ref[k], hv[(q, sh)],
                                    preferred_element_type=f32)
            out_ref[p] = jnp.maximum(acc, 0.0)

    return kernel


# ----------------------------------------------------------------------------
# Wrapper: PyTorch-layout params in, static metadata + layout prep host-side,
# Pallas kernel, host-side de-interleave of phases.
# ----------------------------------------------------------------------------
@functools.partial(jax.jit, static_argnames=("kernel_size", "stride", "padding",
                                             "output_padding", "batch_block"))
def single_decoder_block(x, f, wt, bt, w1, b1, w2, b2, *,
                         kernel_size, stride, padding=1, output_padding=1,
                         batch_block=None):
    # x  : (N, Cin, L)     f : (N, Cf, Lt)
    # wt : (Cin, Ct, K)    bt : (Ct,)          (ConvTranspose1d, PyTorch layout)
    # w1 : (C1, Ct+Cf, K)  b1 : (C1,)          (Conv1d 'same')
    # w2 : (C2, C1, K)     b2 : (C2,)          (Conv1d 'same')
    n, cin, l = x.shape
    k_sz, s, p_t, op = kernel_size, stride, padding, output_padding
    lt = (l - 1) * s - 2 * p_t + k_sz + op
    ct, cf = wt.shape[1], f.shape[1]
    c1, c2 = w1.shape[0], w2.shape[0]
    assert f.shape == (n, cf, lt), "skip connection must match transpose-conv output"
    assert w1.shape[1] == ct + cf and w2.shape[1] == c1
    assert lt >= s >= 1

    # ---- static polyphase metadata -----------------------------------------
    j_full = -(-lt // s)                               # columns per phase
    j_valid = [-(-(lt - p) // s) for p in range(s)]    # valid columns / phase

    taps_t = []                                        # transpose-conv taps
    for p in range(s):
        lst = []
        for k in range(k_sz):
            if (p + p_t - k) % s == 0:
                lst.append((k, (p + p_t - k) // s))
        taps_t.append(tuple(lst))
    all_d = [d for lst in taps_t for (_, d) in lst]
    d_min = min(all_d) if all_d else 0
    d_max = max(all_d) if all_d else 0

    pad_c = (k_sz - 1) // 2                            # PyTorch 'same': left=floor
    shifts = [divmod(p + k - pad_c, s)[0]
              for p in range(s) for k in range(k_sz)]
    halo_l = max(0, -min(shifts))
    halo_r = max(0, max(shifts))
    assert max(halo_l, halo_r, -d_min, d_max) <= _GUARD

    # Per-batch segment: data placed at offset `off`, width `w_seg` (128-mult),
    # chosen so reads for VALID output columns never cross a segment boundary.
    off = max(halo_l, -d_min, 0)
    w_seg = _rup(off + max(l, j_full + max(d_max, halo_r)), 128)

    # ---- channel padding -----------------------------------------------------
    cin_p, c1_p, c2_p = _rup(cin, 8), _rup(c1, 8), _rup(c2, 8)
    ct_p, cf_p = _rup(ct, 16), _rup(cf, 16)        # bf16-tile-friendly concat
    ctcf_p = ct_p + cf_p

    # ---- batch chunk size from a VMEM budget (v7x 64 MiB safe) ---------------
    if batch_block is None:
        budget = 24 << 20

        def _est(nb_):
            wg_ = nb_ * w_seg + 2 * _GUARD
            nbw_ = nb_ * w_seg
            by = 2 * cin_p * wg_ * 2                   # x block, double-buffered
            by += 2 * s * cf_p * wg_ * 2               # fph block
            by += 2 * s * c2_p * nbw_ * 4              # out block (f32)
            by += s * (ctcf_p + c1_p) * wg_ * 2        # scratch
            return by

        nb = n
        while nb > 1 and _est(nb) > budget:
            nb = (nb + 1) // 2
    else:
        nb = min(batch_block, n)
    nb = max(1, nb)
    num_chunks = -(-n // nb)
    n_pad = num_chunks * nb
    nbw = nb * w_seg
    wg = nbw + 2 * _GUARD

    # ---- host-side layout prep (pure data movement) --------------------------
    bf16 = jnp.bfloat16
    xp = jnp.zeros((n_pad, cin_p, w_seg), bf16)
    xp = xp.at[:n, :cin, off:off + l].set(x.astype(bf16))
    xp = xp.reshape(num_chunks, nb, cin_p, w_seg).transpose(0, 2, 1, 3)
    xp = xp.reshape(num_chunks, cin_p, nbw)
    xp = jnp.pad(xp, ((0, 0), (0, 0), (_GUARD, _GUARD)))

    fph = jnp.zeros((n_pad, s, cf_p, w_seg), bf16)
    for p in range(s):
        fph = fph.at[:n, p, :cf, off:off + j_valid[p]].set(
            f[:, :, p::s].astype(bf16))
    fph = fph.reshape(num_chunks, nb, s, cf_p, w_seg).transpose(0, 2, 3, 1, 4)
    fph = fph.reshape(num_chunks, s, cf_p, nbw)
    fph = jnp.pad(fph, ((0, 0), (0, 0), (0, 0), (_GUARD, _GUARD)))

    mask_np = np.zeros((s, 1, nbw), np.float32)
    for p in range(s):
        for b in range(nb):
            mask_np[p, 0, b * w_seg + off:b * w_seg + off + j_valid[p]] = 1.0
    mask = jnp.asarray(mask_np)

    wt_k = jnp.zeros((k_sz, ct_p, cin_p), bf16)
    wt_k = wt_k.at[:, :ct, :cin].set(jnp.transpose(wt, (2, 1, 0)).astype(bf16))
    w1_k = jnp.zeros((k_sz, c1_p, ctcf_p), bf16)            # concatenated w1
    w1_k = w1_k.at[:, :c1, :ct].set(
        jnp.transpose(w1[:, :ct, :], (2, 0, 1)).astype(bf16))
    w1_k = w1_k.at[:, :c1, ct_p:ct_p + cf].set(
        jnp.transpose(w1[:, ct:, :], (2, 0, 1)).astype(bf16))
    w2_k = jnp.zeros((k_sz, c2_p, c1_p), bf16)
    w2_k = w2_k.at[:, :c2, :c1].set(jnp.transpose(w2, (2, 0, 1)).astype(bf16))
    bt_k = jnp.zeros((ct_p, 1), jnp.float32).at[:ct, 0].set(bt)
    b1_k = jnp.zeros((c1_p, 1), jnp.float32).at[:c1, 0].set(b1)
    b2_k = jnp.zeros((c2_p, 1), jnp.float32).at[:c2, 0].set(b2)

    kernel = _make_kernel(s, k_sz, tuple(taps_t), pad_c, _GUARD, nbw,
                          ct_p, ctcf_p, c1_p, c2_p)

    out_ph = pl.pallas_call(
        kernel,
        out_shape=jax.ShapeDtypeStruct((num_chunks, s, c2_p, nbw), jnp.float32),
        grid_spec=pltpu.PrefetchScalarGridSpec(
            num_scalar_prefetch=0,
            grid=(num_chunks,),
            in_specs=[
                pl.BlockSpec((None, cin_p, wg), lambda g: (g, 0, 0)),
                pl.BlockSpec((None, s, cf_p, wg), lambda g: (g, 0, 0, 0)),
                pl.BlockSpec((s, 1, nbw), lambda g: (0, 0, 0)),
                pl.BlockSpec((k_sz, ct_p, cin_p), lambda g: (0, 0, 0)),
                pl.BlockSpec((ct_p, 1), lambda g: (0, 0)),
                pl.BlockSpec((k_sz, c1_p, ctcf_p), lambda g: (0, 0, 0)),
                pl.BlockSpec((c1_p, 1), lambda g: (0, 0)),
                pl.BlockSpec((k_sz, c2_p, c1_p), lambda g: (0, 0, 0)),
                pl.BlockSpec((c2_p, 1), lambda g: (0, 0)),
            ],
            out_specs=pl.BlockSpec((None, s, c2_p, nbw),
                                   lambda g: (g, 0, 0, 0)),
            scratch_shapes=(
                [pltpu.VMEM((ctcf_p, wg), jnp.bfloat16) for _ in range(s)]
                + [pltpu.VMEM((c1_p, wg), jnp.bfloat16) for _ in range(s)]),
        ),
        compiler_params=pltpu.CompilerParams(
            dimension_semantics=("parallel",),
            vmem_limit_bytes=48 * 1024 * 1024),
    )(xp, fph, mask, wt_k, bt_k, w1_k, b1_k, w2_k, b2_k)

    # De-interleave phase-major slabs back to (N, C2, Lt).
    out_ph = out_ph.reshape(num_chunks, s, c2_p, nb, w_seg)
    out_ph = out_ph[..., off:off + j_full]               # (chunks,S,C2p,nb,J)
    out_ph = out_ph.transpose(0, 3, 2, 4, 1)             # (chunks,nb,C2p,J,S)
    out = out_ph.reshape(num_chunks * nb, c2_p, j_full * s)
    return out[:n, :c2, :lt]


# ----------------------------------------------------------------------------
# Pure-JAX reference (lax convs, PyTorch weight layouts) for verification.
# ----------------------------------------------------------------------------
def _ref_conv_transpose1d(x, w, b, stride, padding, output_padding):
    kk = w.shape[-1]
    rhs = jnp.transpose(jnp.flip(w, axis=-1), (1, 0, 2))  # (Cout, Cin, K)
    out = lax.conv_general_dilated(
        x, rhs, window_strides=(1,),
        padding=[(kk - 1 - padding, kk - 1 - padding + output_padding)],
        lhs_dilation=(stride,), rhs_dilation=(1,),
        dimension_numbers=("NCH", "OIH", "NCH"))
    return out + b[None, :, None]


def _ref_conv1d_same(x, w, b):
    kk = w.shape[-1]
    left = (kk - 1) // 2
    right = kk - 1 - left
    out = lax.conv_general_dilated(
        x, w, window_strides=(1,), padding=[(left, right)],
        dimension_numbers=("NCH", "OIH", "NCH"))
    return out + b[None, :, None]


def _reference(x, f, wt, bt, w1, b1, w2, b2, stride, padding, output_padding):
    y = _ref_conv_transpose1d(x, wt, bt, stride, padding, output_padding)
    y = jnp.concatenate([y, f], axis=1)
    y = jax.nn.relu(_ref_conv1d_same(y, w1, b1))
    y = jax.nn.relu(_ref_conv1d_same(y, w2, b2))
    return y


if __name__ == "__main__":
    # SingleDecoderBlock(in_channels=8, out_channels=4, kernel_size=3, stride=2);
    # concat requires skip_channels == in_channels - out_channels.
    batch, in_channels, out_channels = 2, 8, 4
    kernel_size, stride, padding, output_padding = 3, 2, 1, 1
    seq = 8
    seq_out = (seq - 1) * stride - 2 * padding + kernel_size + output_padding  # 16
    skip_channels = in_channels - out_channels                                 # 4

    key = jax.random.PRNGKey(0)
    kx, kf, k1, k2, k3, k4, k5, k6 = jax.random.split(key, 8)

    x = jax.random.normal(kx, (batch, in_channels, seq), jnp.float32)
    f = jax.random.normal(kf, (batch, skip_channels, seq_out), jnp.float32)

    # Parameters in PyTorch layouts.
    wt = 0.2 * jax.random.normal(k1, (in_channels, out_channels, kernel_size), jnp.float32)
    bt = 0.1 * jax.random.normal(k2, (out_channels,), jnp.float32)
    w1 = 0.2 * jax.random.normal(k3, (out_channels, in_channels, kernel_size), jnp.float32)
    b1 = 0.1 * jax.random.normal(k4, (out_channels,), jnp.float32)
    w2 = 0.2 * jax.random.normal(k5, (out_channels, out_channels, kernel_size), jnp.float32)
    b2 = 0.1 * jax.random.normal(k6, (out_channels,), jnp.float32)

    out = single_decoder_block(
        x, f, wt, bt, w1, b1, w2, b2,
        kernel_size=kernel_size, stride=stride,
        padding=padding, output_padding=output_padding)
    out = jax.block_until_ready(out)

    ref = _reference(x, f, wt, bt, w1, b1, w2, b2, stride, padding, output_padding)
    ref = jax.block_until_ready(ref)

    # bf16 activations/weights with f32 accumulation -> loosened tolerance.
    np.testing.assert_allclose(np.asarray(out), np.asarray(ref), rtol=5e-2, atol=5e-2)
    print("KERNEL_OK")
</pallas_src>

<mosaic_0001>
module attributes {stable_mosaic.version = 11 : i64} {
  func.func @kernel(%arg0: i32, %arg1: memref<1x8x512xbf16, #tpu.memory_space<vmem>>, %arg2: memref<1x2x16x512xbf16, #tpu.memory_space<vmem>>, %arg3: memref<2x1x256xf32, #tpu.memory_space<vmem>>, %arg4: memref<3x16x8xbf16, #tpu.memory_space<vmem>>, %arg5: memref<16x1xf32, #tpu.memory_space<vmem>>, %arg6: memref<3x8x32xbf16, #tpu.memory_space<vmem>>, %arg7: memref<8x1xf32, #tpu.memory_space<vmem>>, %arg8: memref<3x8x8xbf16, #tpu.memory_space<vmem>>, %arg9: memref<8x1xf32, #tpu.memory_space<vmem>>, %arg10: memref<1x2x8x256xf32, #tpu.memory_space<vmem>>, %arg11: memref<32x512xbf16, #tpu.memory_space<vmem>>, %arg12: memref<32x512xbf16, #tpu.memory_space<vmem>>, %arg13: memref<8x512xbf16, #tpu.memory_space<vmem>>, %arg14: memref<8x512xbf16, #tpu.memory_space<vmem>>) attributes {dimension_semantics = [#tpu.dimension_semantics<parallel>], iteration_bounds = array<i64: 1>, scalar_prefetch = 0 : i64, scratch_operands = 4 : i64, tpu.core_type = #tpu.core_type<tc>, window_params = [{transform_indices = @transform_0, window_bounds = array<i64: 1, 8, 512>}, {transform_indices = @transform_1, window_bounds = array<i64: 1, 2, 16, 512>}, {pipeline_mode = #tpu.pipeline_mode<synchronous>, transform_indices = @transform_2, window_bounds = array<i64: 2, 1, 256>}, {pipeline_mode = #tpu.pipeline_mode<synchronous>, transform_indices = @transform_3, window_bounds = array<i64: 3, 16, 8>}, {pipeline_mode = #tpu.pipeline_mode<synchronous>, transform_indices = @transform_4, window_bounds = array<i64: 16, 1>}, {pipeline_mode = #tpu.pipeline_mode<synchronous>, transform_indices = @transform_5, window_bounds = array<i64: 3, 8, 32>}, {pipeline_mode = #tpu.pipeline_mode<synchronous>, transform_indices = @transform_6, window_bounds = array<i64: 8, 1>}, {pipeline_mode = #tpu.pipeline_mode<synchronous>, transform_indices = @transform_7, window_bounds = array<i64: 3, 8, 8>}, {pipeline_mode = #tpu.pipeline_mode<synchronous>, transform_indices = @transform_8, window_bounds = array<i64: 8, 1>}, {transform_indices = @transform_9, window_bounds = array<i64: 1, 2, 8, 256>}]} {
    %c0 = arith.constant 0 : index
    %c0_0 = arith.constant 0 : index
    %0 = vector.load %arg5[%c0, %c0_0] : memref<16x1xf32, #tpu.memory_space<vmem>>, vector<16x1xf32>
    %1 = vector.shape_cast %0 : vector<16x1xf32> to vector<16x1xf32>
    %2 = vector.broadcast %1 : vector<16x1xf32> to vector<16x256xf32>
    %c0_1 = arith.constant 0 : index
    %c0_2 = arith.constant 0 : index
    %3 = vector.load %arg7[%c0_1, %c0_2] : memref<8x1xf32, #tpu.memory_space<vmem>>, vector<8x1xf32>
    %4 = vector.shape_cast %3 : vector<8x1xf32> to vector<8x1xf32>
    %5 = vector.broadcast %4 : vector<8x1xf32> to vector<8x256xf32>
    %c0_3 = arith.constant 0 : index
    %c0_4 = arith.constant 0 : index
    %6 = vector.load %arg9[%c0_3, %c0_4] : memref<8x1xf32, #tpu.memory_space<vmem>>, vector<8x1xf32>
    %7 = vector.shape_cast %6 : vector<8x1xf32> to vector<8x1xf32>
    %8 = vector.broadcast %7 : vector<8x1xf32> to vector<8x256xf32>
    %c0_5 = arith.constant 0 : index
    %c0_6 = arith.constant 0 : index
    %c0_7 = arith.constant 0 : index
    %9 = vector.load %arg3[%c0_5, %c0_6, %c0_7] : memref<2x1x256xf32, #tpu.memory_space<vmem>>, vector<1x1x256xf32>
    %10 = vector.shape_cast %9 : vector<1x1x256xf32> to vector<1x256xf32>
    %cst = arith.constant 5.000000e-01 : f32
    %11 = vector.broadcast %cst : f32 to vector<1x256xf32>
    %12 = arith.cmpf ogt, %10, %11 : vector<1x256xf32>
    %c1 = arith.constant 1 : index
    %c0_8 = arith.constant 0 : index
    %c0_9 = arith.constant 0 : index
    %13 = vector.load %arg3[%c1, %c0_8, %c0_9] : memref<2x1x256xf32, #tpu.memory_space<vmem>>, vector<1x1x256xf32>
    %14 = vector.shape_cast %13 : vector<1x1x256xf32> to vector<1x256xf32>
    %cst_10 = arith.constant 5.000000e-01 : f32
    %15 = vector.broadcast %cst_10 : f32 to vector<1x256xf32>
    %16 = arith.cmpf ogt, %14, %15 : vector<1x256xf32>
    %c0_11 = arith.constant 0 : index
    %c0_12 = arith.constant 0 : index
    %c128 = arith.constant 128 : index
    %17 = vector.load %arg1[%c0_11, %c0_12, %c128] : memref<1x8x512xbf16, #tpu.memory_space<vmem>>, vector<1x8x256xbf16>
    %18 = vector.shape_cast %17 : vector<1x8x256xbf16> to vector<8x256xbf16>
    %c0_13 = arith.constant 0 : index
    %c0_14 = arith.constant 0 : index
    %c129 = arith.constant 129 : index
    %19 = vector.load %arg1[%c0_13, %c0_14, %c129] : memref<1x8x512xbf16, #tpu.memory_space<vmem>>, vector<1x8x256xbf16>
    %20 = vector.shape_cast %19 : vector<1x8x256xbf16> to vector<8x256xbf16>
    %c1_15 = arith.constant 1 : index
    %c0_16 = arith.constant 0 : index
    %c0_17 = arith.constant 0 : index
    %21 = vector.load %arg4[%c1_15, %c0_16, %c0_17] : memref<3x16x8xbf16, #tpu.memory_space<vmem>>, vector<1x16x8xbf16>
    %22 = vector.shape_cast %21 : vector<1x16x8xbf16> to vector<16x8xbf16>
    %cst_18 = arith.constant dense<0.000000e+00> : vector<16x256xf32>
    %23 = tpu.matmul %22, %18, %cst_18 {dimension_numbers = #tpu.dot_dimension_numbers<[1], [0], [0], [1], [0, 0, 1, 1], [], []>} : vector<16x8xbf16>, vector<8x256xbf16>, vector<16x256xf32> -> vector<16x256xf32>
    %24 = arith.addf %2, %23 : vector<16x256xf32>
    %cst_19 = arith.constant 0.000000e+00 : f32
    %25 = vector.shape_cast %12 : vector<1x256xi1> to vector<1x256xi1>
    %26 = vector.broadcast %25 : vector<1x256xi1> to vector<16x256xi1>
    %27 = vector.broadcast %cst_19 : f32 to vector<16x256xf32>
    %28 = arith.select %26, %24, %27 : vector<16x256xi1>, vector<16x256xf32>
    %29 = arith.truncf %28 : vector<16x256xf32> to vector<16x256xbf16>
    %c0_20 = arith.constant 0 : index
    %c128_21 = arith.constant 128 : index
    %30 = vector.load %arg11[%c0_20, %c128_21] : memref<32x512xbf16, #tpu.memory_space<vmem>>, vector<16x256xbf16>
    tpu.vector_store %arg11[%c0_20, %c128_21], %29 {strides = array<i32>} : memref<32x512xbf16, #tpu.memory_space<vmem>>, vector<16x256xbf16>,
    %c0_22 = arith.constant 0 : index
    %c0_23 = arith.constant 0 : index
    %c0_24 = arith.constant 0 : index
    %c0_25 = arith.constant 0 : index
    %31 = vector.load %arg2[%c0_22, %c0_23, %c0_24, %c0_25] : memref<1x2x16x512xbf16, #tpu.memory_space<vmem>>, vector<1x1x16x512xbf16>
    %32 = vector.shape_cast %31 : vector<1x1x16x512xbf16> to vector<16x512xbf16>
    %c16 = arith.constant 16 : index
    %c0_26 = arith.constant 0 : index
    %33 = vector.load %arg11[%c16, %c0_26] : memref<32x512xbf16, #tpu.memory_space<vmem>>, vector<16x512xbf16>
    tpu.vector_store %arg11[%c16, %c0_26], %32 {strides = array<i32>} : memref<32x512xbf16, #tpu.memory_space<vmem>>, vector<16x512xbf16>,
    %c0_27 = arith.constant 0 : index
    %c0_28 = arith.constant 0 : index
    %c0_29 = arith.constant 0 : index
    %34 = vector.load %arg4[%c0_27, %c0_28, %c0_29] : memref<3x16x8xbf16, #tpu.memory_space<vmem>>, vector<1x16x8xbf16>
    %35 = vector.shape_cast %34 : vector<1x16x8xbf16> to vector<16x8xbf16>
    %cst_30 = arith.constant dense<0.000000e+00> : vector<16x256xf32>
    %36 = tpu.matmul %35, %20, %cst_30 {dimension_numbers = #tpu.dot_dimension_numbers<[1], [0], [0], [1], [0, 0, 1, 1], [], []>} : vector<16x8xbf16>, vector<8x256xbf16>, vector<16x256xf32> -> vector<16x256xf32>
    %37 = arith.addf %2, %36 : vector<16x256xf32>
    %c2 = arith.constant 2 : index
    %c0_31 = arith.constant 0 : index
    %c0_32 = arith.constant 0 : index
    %38 = vector.load %arg4[%c2, %c0_31, %c0_32] : memref<3x16x8xbf16, #tpu.memory_space<vmem>>, vector<1x16x8xbf16>
    %39 = vector.shape_cast %38 : vector<1x16x8xbf16> to vector<16x8xbf16>
    %cst_33 = arith.constant dense<0.000000e+00> : vector<16x256xf32>
    %40 = tpu.matmul %39, %18, %cst_33 {dimension_numbers = #tpu.dot_dimension_numbers<[1], [0], [0], [1], [0, 0, 1, 1], [], []>} : vector<16x8xbf16>, vector<8x256xbf16>, vector<16x256xf32> -> vector<16x256xf32>
    %41 = arith.addf %37, %40 : vector<16x256xf32>
    %cst_34 = arith.constant 0.000000e+00 : f32
    %42 = vector.shape_cast %16 : vector<1x256xi1> to vector<1x256xi1>
    %43 = vector.broadcast %42 : vector<1x256xi1> to vector<16x256xi1>
    %44 = vector.broadcast %cst_34 : f32 to vector<16x256xf32>
    %45 = arith.select %43, %41, %44 : vector<16x256xi1>, vector<16x256xf32>
    %46 = arith.truncf %45 : vector<16x256xf32> to vector<16x256xbf16>
    %c0_35 = arith.constant 0 : index
    %c128_36 = arith.constant 128 : index
    %47 = vector.load %arg12[%c0_35, %c128_36] : memref<32x512xbf16, #tpu.memory_space<vmem>>, vector<16x256xbf16>
    tpu.vector_store %arg12[%c0_35, %c128_36], %46 {strides = array<i32>} : memref<32x512xbf16, #tpu.memory_space<vmem>>, vector<16x256xbf16>,
    %c0_37 = arith.constant 0 : index
    %c1_38 = arith.constant 1 : index
    %c0_39 = arith.constant 0 : index
    %c0_40 = arith.constant 0 : index
    %48 = vector.load %arg2[%c0_37, %c1_38, %c0_39, %c0_40] : memref<1x2x16x512xbf16, #tpu.memory_space<vmem>>, vector<1x1x16x512xbf16>
    %49 = vector.shape_cast %48 : vector<1x1x16x512xbf16> to vector<16x512xbf16>
    %c16_41 = arith.constant 16 : index
    %c0_42 = arith.constant 0 : index
    %50 = vector.load %arg12[%c16_41, %c0_42] : memref<32x512xbf16, #tpu.memory_space<vmem>>, vector<16x512xbf16>
    tpu.vector_store %arg12[%c16_41, %c0_42], %49 {strides = array<i32>} : memref<32x512xbf16, #tpu.memory_space<vmem>>, vector<16x512xbf16>,
    %c0_43 = arith.constant 0 : index
    %c127 = arith.constant 127 : index
    %51 = vector.load %arg12[%c0_43, %c127] : memref<32x512xbf16, #tpu.memory_space<vmem>>, vector<32x256xbf16>
    %c0_44 = arith.constant 0 : index
    %c128_45 = arith.constant 128 : index
    %52 = vector.load %arg11[%c0_44, %c128_45] : memref<32x512xbf16, #tpu.memory_space<vmem>>, vector<32x256xbf16>
    %c0_46 = arith.constant 0 : index
    %c128_47 = arith.constant 128 : index
    %53 = vector.load %arg12[%c0_46, %c128_47] : memref<32x512xbf16, #tpu.memory_space<vmem>>, vector<32x256xbf16>
    %c0_48 = arith.constant 0 : index
    %c129_49 = arith.constant 129 : index
    %54 = vector.load %arg11[%c0_48, %c129_49] : memref<32x512xbf16, #tpu.memory_space<vmem>>, vector<32x256xbf16>
    %c0_50 = arith.constant 0 : index
    %c0_51 = arith.constant 0 : index
    %c0_52 = arith.constant 0 : index
    %55 = vector.load %arg6[%c0_50, %c0_51, %c0_52] : memref<3x8x32xbf16, #tpu.memory_space<vmem>>, vector<1x8x32xbf16>
    %56 = vector.shape_cast %55 : vector<1x8x32xbf16> to vector<8x32xbf16>
    %cst_53 = arith.constant dense<0.000000e+00> : vector<8x256xf32>
    %57 = tpu.matmul %56, %51, %cst_53 {dimension_numbers = #tpu.dot_dimension_numbers<[1], [0], [0], [1], [0, 0, 1, 1], [], []>} : vector<8x32xbf16>, vector<32x256xbf16>, vector<8x256xf32> -> vector<8x256xf32>
    %58 = arith.addf %5, %57 : vector<8x256xf32>
    %c1_54 = arith.constant 1 : index
    %c0_55 = arith.constant 0 : index
    %c0_56 = arith.constant 0 : index
    %59 = vector.load %arg6[%c1_54, %c0_55, %c0_56] : memref<3x8x32xbf16, #tpu.memory_space<vmem>>, vector<1x8x32xbf16>
    %60 = vector.shape_cast %59 : vector<1x8x32xbf16> to vector<8x32xbf16>
    %cst_57 = arith.constant dense<0.000000e+00> : vector<8x256xf32>
    %61 = tpu.matmul %60, %52, %cst_57 {dimension_numbers = #tpu.dot_dimension_numbers<[1], [0], [0], [1], [0, 0, 1, 1], [], []>} : vector<8x32xbf16>, vector<32x256xbf16>, vector<8x256xf32> -> vector<8x256xf32>
    %62 = arith.addf %58, %61 : vector<8x256xf32>
    %c2_58 = arith.constant 2 : index
    %c0_59 = arith.constant 0 : index
    %c0_60 = arith.constant 0 : index
    %63 = vector.load %arg6[%c2_58, %c0_59, %c0_60] : memref<3x8x32xbf16, #tpu.memory_space<vmem>>, vector<1x8x32xbf16>
    %64 = vector.shape_cast %63 : vector<1x8x32xbf16> to vector<8x32xbf16>
    %cst_61 = arith.constant dense<0.000000e+00> : vector<8x256xf32>
    %65 = tpu.matmul %64, %53, %cst_61 {dimension_numbers = #tpu.dot_dimension_numbers<[1], [0], [0], [1], [0, 0, 1, 1], [], []>} : vector<8x32xbf16>, vector<32x256xbf16>, vector<8x256xf32> -> vector<8x256xf32>
    %66 = arith.addf %62, %65 : vector<8x256xf32>
    %cst_62 = arith.constant 0.000000e+00 : f32
    %67 = vector.broadcast %cst_62 : f32 to vector<8x256xf32>
    %68 = arith.maximumf %66, %67 : vector<8x256xf32>
    %cst_63 = arith.constant 0.000000e+00 : f32
    %69 = vector.shape_cast %12 : vector<1x256xi1> to vector<1x256xi1>
    %70 = vector.broadcast %69 : vector<1x256xi1> to vector<8x256xi1>
    %71 = vector.broadcast %cst_63 : f32 to vector<8x256xf32>
    %72 = arith.select %70, %68, %71 : vector<8x256xi1>, vector<8x256xf32>
    %73 = arith.truncf %72 : vector<8x256xf32> to vector<8x256xbf16>
    %c0_64 = arith.constant 0 : index
    %c128_65 = arith.constant 128 : index
    %74 = vector.load %arg13[%c0_64, %c128_65] : memref<8x512xbf16, #tpu.memory_space<vmem>>, vector<8x256xbf16>
    tpu.vector_store %arg13[%c0_64, %c128_65], %73 {strides = array<i32>} : memref<8x512xbf16, #tpu.memory_space<vmem>>, vector<8x256xbf16>,
    %c0_66 = arith.constant 0 : index
    %c0_67 = arith.constant 0 : index
    %c0_68 = arith.constant 0 : index
    %75 = vector.load %arg6[%c0_66, %c0_67, %c0_68] : memref<3x8x32xbf16, #tpu.memory_space<vmem>>, vector<1x8x32xbf16>
    %76 = vector.shape_cast %75 : vector<1x8x32xbf16> to vector<8x32xbf16>
    %cst_69 = arith.constant dense<0.000000e+00> : vector<8x256xf32>
    %77 = tpu.matmul %76, %52, %cst_69 {dimension_numbers = #tpu.dot_dimension_numbers<[1], [0], [0], [1], [0, 0, 1, 1], [], []>} : vector<8x32xbf16>, vector<32x256xbf16>, vector<8x256xf32> -> vector<8x256xf32>
    %78 = arith.addf %5, %77 : vector<8x256xf32>
    %c1_70 = arith.constant 1 : index
    %c0_71 = arith.constant 0 : index
    %c0_72 = arith.constant 0 : index
    %79 = vector.load %arg6[%c1_70, %c0_71, %c0_72] : memref<3x8x32xbf16, #tpu.memory_space<vmem>>, vector<1x8x32xbf16>
    %80 = vector.shape_cast %79 : vector<1x8x32xbf16> to vector<8x32xbf16>
    %cst_73 = arith.constant dense<0.000000e+00> : vector<8x256xf32>
    %81 = tpu.matmul %80, %53, %cst_73 {dimension_numbers = #tpu.dot_dimension_numbers<[1], [0], [0], [1], [0, 0, 1, 1], [], []>} : vector<8x32xbf16>, vector<32x256xbf16>, vector<8x256xf32> -> vector<8x256xf32>
    %82 = arith.addf %78, %81 : vector<8x256xf32>
    %c2_74 = arith.constant 2 : index
    %c0_75 = arith.constant 0 : index
    %c0_76 = arith.constant 0 : index
    %83 = vector.load %arg6[%c2_74, %c0_75, %c0_76] : memref<3x8x32xbf16, #tpu.memory_space<vmem>>, vector<1x8x32xbf16>
    %84 = vector.shape_cast %83 : vector<1x8x32xbf16> to vector<8x32xbf16>
    %cst_77 = arith.constant dense<0.000000e+00> : vector<8x256xf32>
    %85 = tpu.matmul %84, %54, %cst_77 {dimension_numbers = #tpu.dot_dimension_numbers<[1], [0], [0], [1], [0, 0, 1, 1], [], []>} : vector<8x32xbf16>, vector<32x256xbf16>, vector<8x256xf32> -> vector<8x256xf32>
    %86 = arith.addf %82, %85 : vector<8x256xf32>
    %cst_78 = arith.constant 0.000000e+00 : f32
    %87 = vector.broadcast %cst_78 : f32 to vector<8x256xf32>
    %88 = arith.maximumf %86, %87 : vector<8x256xf32>
    %cst_79 = arith.constant 0.000000e+00 : f32
    %89 = vector.shape_cast %16 : vector<1x256xi1> to vector<1x256xi1>
    %90 = vector.broadcast %89 : vector<1x256xi1> to vector<8x256xi1>
    %91 = vector.broadcast %cst_79 : f32 to vector<8x256xf32>
    %92 = arith.select %90, %88, %91 : vector<8x256xi1>, vector<8x256xf32>
    %93 = arith.truncf %92 : vector<8x256xf32> to vector<8x256xbf16>
    %c0_80 = arith.constant 0 : index
    %c128_81 = arith.constant 128 : index
    %94 = vector.load %arg14[%c0_80, %c128_81] : memref<8x512xbf16, #tpu.memory_space<vmem>>, vector<8x256xbf16>
    tpu.vector_store %arg14[%c0_80, %c128_81], %93 {strides = array<i32>} : memref<8x512xbf16, #tpu.memory_space<vmem>>, vector<8x256xbf16>,
    %c0_82 = arith.constant 0 : index
    %c127_83 = arith.constant 127 : index
    %95 = vector.load %arg14[%c0_82, %c127_83] : memref<8x512xbf16, #tpu.memory_space<vmem>>, vector<8x256xbf16>
    %c0_84 = arith.constant 0 : index
    %c128_85 = arith.constant 128 : index
    %96 = vector.load %arg13[%c0_84, %c128_85] : memref<8x512xbf16, #tpu.memory_space<vmem>>, vector<8x256xbf16>
    %c0_86 = arith.constant 0 : index
    %c128_87 = arith.constant 128 : index
    %97 = vector.load %arg14[%c0_86, %c128_87] : memref<8x512xbf16, #tpu.memory_space<vmem>>, vector<8x256xbf16>
    %c0_88 = arith.constant 0 : index
    %c129_89 = arith.constant 129 : index
    %98 = vector.load %arg13[%c0_88, %c129_89] : memref<8x512xbf16, #tpu.memory_space<vmem>>, vector<8x256xbf16>
    %c0_90 = arith.constant 0 : index
    %c0_91 = arith.constant 0 : index
    %c0_92 = arith.constant 0 : index
    %99 = vector.load %arg8[%c0_90, %c0_91, %c0_92] : memref<3x8x8xbf16, #tpu.memory_space<vmem>>, vector<1x8x8xbf16>
    %100 = vector.shape_cast %99 : vector<1x8x8xbf16> to vector<8x8xbf16>
    %cst_93 = arith.constant dense<0.000000e+00> : vector<8x256xf32>
    %101 = tpu.matmul %100, %95, %cst_93 {dimension_numbers = #tpu.dot_dimension_numbers<[1], [0], [0], [1], [0, 0, 1, 1], [], []>} : vector<8x8xbf16>, vector<8x256xbf16>, vector<8x256xf32> -> vector<8x256xf32>
    %102 = arith.addf %8, %101 : vector<8x256xf32>
    %c1_94 = arith.constant 1 : index
    %c0_95 = arith.constant 0 : index
    %c0_96 = arith.constant 0 : index
    %103 = vector.load %arg8[%c1_94, %c0_95, %c0_96] : memref<3x8x8xbf16, #tpu.memory_space<vmem>>, vector<1x8x8xbf16>
    %104 = vector.shape_cast %103 : vector<1x8x8xbf16> to vector<8x8xbf16>
    %cst_97 = arith.constant dense<0.000000e+00> : vector<8x256xf32>
    %105 = tpu.matmul %104, %96, %cst_97 {dimension_numbers = #tpu.dot_dimension_numbers<[1], [0], [0], [1], [0, 0, 1, 1], [], []>} : vector<8x8xbf16>, vector<8x256xbf16>, vector<8x256xf32> -> vector<8x256xf32>
    %106 = arith.addf %102, %105 : vector<8x256xf32>
    %c2_98 = arith.constant 2 : index
    %c0_99 = arith.constant 0 : index
    %c0_100 = arith.constant 0 : index
    %107 = vector.load %arg8[%c2_98, %c0_99, %c0_100] : memref<3x8x8xbf16, #tpu.memory_space<vmem>>, vector<1x8x8xbf16>
    %108 = vector.shape_cast %107 : vector<1x8x8xbf16> to vector<8x8xbf16>
    %cst_101 = arith.constant dense<0.000000e+00> : vector<8x256xf32>
    %109 = tpu.matmul %108, %97, %cst_101 {dimension_numbers = #tpu.dot_dimension_numbers<[1], [0], [0], [1], [0, 0, 1, 1], [], []>} : vector<8x8xbf16>, vector<8x256xbf16>, vector<8x256xf32> -> vector<8x256xf32>
    %110 = arith.addf %106, %109 : vector<8x256xf32>
    %cst_102 = arith.constant 0.000000e+00 : f32
    %111 = vector.broadcast %cst_102 : f32 to vector<8x256xf32>
    %112 = arith.maximumf %110, %111 : vector<8x256xf32>
    %c0_103 = arith.constant 0 : index
    %c0_104 = arith.constant 0 : index
    %c0_105 = arith.constant 0 : index
    %c0_106 = arith.constant 0 : index
    %113 = vector.load %arg10[%c0_103, %c0_104, %c0_105, %c0_106] : memref<1x2x8x256xf32, #tpu.memory_space<vmem>>, vector<1x1x8x256xf32>
    %114 = vector.shape_cast %113 : vector<1x1x8x256xf32> to vector<8x256xf32>
    %115 = vector.shape_cast %112 : vector<8x256xf32> to vector<1x1x8x256xf32>
    tpu.vector_store %arg10[%c0_103, %c0_104, %c0_105, %c0_106], %115 {strides = array<i32>} : memref<1x2x8x256xf32, #tpu.memory_space<vmem>>, vector<1x1x8x256xf32>,
    %c0_107 = arith.constant 0 : index
    %c0_108 = arith.constant 0 : index
    %c0_109 = arith.constant 0 : index
    %116 = vector.load %arg8[%c0_107, %c0_108, %c0_109] : memref<3x8x8xbf16, #tpu.memory_space<vmem>>, vector<1x8x8xbf16>
    %117 = vector.shape_cast %116 : vector<1x8x8xbf16> to vector<8x8xbf16>
    %cst_110 = arith.constant dense<0.000000e+00> : vector<8x256xf32>
    %118 = tpu.matmul %117, %96, %cst_110 {dimension_numbers = #tpu.dot_dimension_numbers<[1], [0], [0], [1], [0, 0, 1, 1], [], []>} : vector<8x8xbf16>, vector<8x256xbf16>, vector<8x256xf32> -> vector<8x256xf32>
    %119 = arith.addf %8, %118 : vector<8x256xf32>
    %c1_111 = arith.constant 1 : index
    %c0_112 = arith.constant 0 : index
    %c0_113 = arith.constant 0 : index
    %120 = vector.load %arg8[%c1_111, %c0_112, %c0_113] : memref<3x8x8xbf16, #tpu.memory_space<vmem>>, vector<1x8x8xbf16>
    %121 = vector.shape_cast %120 : vector<1x8x8xbf16> to vector<8x8xbf16>
    %cst_114 = arith.constant dense<0.000000e+00> : vector<8x256xf32>
    %122 = tpu.matmul %121, %97, %cst_114 {dimension_numbers = #tpu.dot_dimension_numbers<[1], [0], [0], [1], [0, 0, 1, 1], [], []>} : vector<8x8xbf16>, vector<8x256xbf16>, vector<8x256xf32> -> vector<8x256xf32>
    %123 = arith.addf %119, %122 : vector<8x256xf32>
    %c2_115 = arith.constant 2 : index
    %c0_116 = arith.constant 0 : index
    %c0_117 = arith.constant 0 : index
    %124 = vector.load %arg8[%c2_115, %c0_116, %c0_117] : memref<3x8x8xbf16, #tpu.memory_space<vmem>>, vector<1x8x8xbf16>
    %125 = vector.shape_cast %124 : vector<1x8x8xbf16> to vector<8x8xbf16>
    %cst_118 = arith.constant dense<0.000000e+00> : vector<8x256xf32>
    %126 = tpu.matmul %125, %98, %cst_118 {dimension_numbers = #tpu.dot_dimension_numbers<[1], [0], [0], [1], [0, 0, 1, 1], [], []>} : vector<8x8xbf16>, vector<8x256xbf16>, vector<8x256xf32> -> vector<8x256xf32>
    %127 = arith.addf %123, %126 : vector<8x256xf32>
    %cst_119 = arith.constant 0.000000e+00 : f32
    %128 = vector.broadcast %cst_119 : f32 to vector<8x256xf32>
    %129 = arith.maximumf %127, %128 : vector<8x256xf32>
    %c0_120 = arith.constant 0 : index
    %c1_121 = arith.constant 1 : index
    %c0_122 = arith.constant 0 : index
    %c0_123 = arith.constant 0 : index
    %130 = vector.load %arg10[%c0_120, %c1_121, %c0_122, %c0_123] : memref<1x2x8x256xf32, #tpu.memory_space<vmem>>, vector<1x1x8x256xf32>
    %131 = vector.shape_cast %130 : vector<1x1x8x256xf32> to vector<8x256xf32>
    %132 = vector.shape_cast %129 : vector<8x256xf32> to vector<1x1x8x256xf32>
    tpu.vector_store %arg10[%c0_120, %c1_121, %c0_122, %c0_123], %132 {strides = array<i32>} : memref<1x2x8x256xf32, #tpu.memory_space<vmem>>, vector<1x1x8x256xf32>,
    return
  }
  func.func @transform_0(%arg0: i32) -> (i32, i32, i32) {
    %c0_i32 = arith.constant 0 : i32
    %c0_i32_0 = arith.constant 0 : i32
    %c0_i32_1 = arith.constant 0 : i32
    return %arg0, %c0_i32, %c0_i32_0 : i32, i32, i32
  }
  func.func @transform_1(%arg0: i32) -> (i32, i32, i32, i32) {
    %c0_i32 = arith.constant 0 : i32
    %c0_i32_0 = arith.constant 0 : i32
    %c0_i32_1 = arith.constant 0 : i32
    %c0_i32_2 = arith.constant 0 : i32
    return %arg0, %c0_i32, %c0_i32_0, %c0_i32_1 : i32, i32, i32, i32
  }
  func.func @transform_2(%arg0: i32) -> (i32, i32, i32) {
    %c0_i32 = arith.constant 0 : i32
    %c0_i32_0 = arith.constant 0 : i32
    %c0_i32_1 = arith.constant 0 : i32
    %c0_i32_2 = arith.constant 0 : i32
    return %c0_i32, %c0_i32_0, %c0_i32_1 : i32, i32, i32
  }
  func.func @transform_3(%arg0: i32) -> (i32, i32, i32) {
    %c0_i32 = arith.constant 0 : i32
    %c0_i32_0 = arith.constant 0 : i32
    %c0_i32_1 = arith.constant 0 : i32
    %c0_i32_2 = arith.constant 0 : i32
    return %c0_i32, %c0_i32_0, %c0_i32_1 : i32, i32, i32
  }
  func.func @transform_4(%arg0: i32) -> (i32, i32) {
    %c0_i32 = arith.constant 0 : i32
    %c0_i32_0 = arith.constant 0 : i32
    %c0_i32_1 = arith.constant 0 : i32
    return %c0_i32, %c0_i32_0 : i32, i32
  }
  func.func @transform_5(%arg0: i32) -> (i32, i32, i32) {
    %c0_i32 = arith.constant 0 : i32
    %c0_i32_0 = arith.constant 0 : i32
    %c0_i32_1 = arith.constant 0 : i32
    %c0_i32_2 = arith.constant 0 : i32
    return %c0_i32, %c0_i32_0, %c0_i32_1 : i32, i32, i32
  }
  func.func @transform_6(%arg0: i32) -> (i32, i32) {
    %c0_i32 = arith.constant 0 : i32
    %c0_i32_0 = arith.constant 0 : i32
    %c0_i32_1 = arith.constant 0 : i32
    return %c0_i32, %c0_i32_0 : i32, i32
  }
  func.func @transform_7(%arg0: i32) -> (i32, i32, i32) {
    %c0_i32 = arith.constant 0 : i32
    %c0_i32_0 = arith.constant 0 : i32
    %c0_i32_1 = arith.constant 0 : i32
    %c0_i32_2 = arith.constant 0 : i32
    return %c0_i32, %c0_i32_0, %c0_i32_1 : i32, i32, i32
  }
  func.func @transform_8(%arg0: i32) -> (i32, i32) {
    %c0_i32 = arith.constant 0 : i32
    %c0_i32_0 = arith.constant 0 : i32
    %c0_i32_1 = arith.constant 0 : i32
    return %c0_i32, %c0_i32_0 : i32, i32
  }
  func.func @transform_9(%arg0: i32) -> (i32, i32, i32, i32) {
    %c0_i32 = arith.constant 0 : i32
    %c0_i32_0 = arith.constant 0 : i32
    %c0_i32_1 = arith.constant 0 : i32
    %c0_i32_2 = arith.constant 0 : i32
    return %arg0, %c0_i32, %c0_i32_0, %c0_i32_1 : i32, i32, i32, i32
  }
}

</mosaic_0001>

<bundles_post_ra>
// kernel: single_decoder_block.1
= control target key start
LH: loop header
LB: loop body
LE: loop exit
PB: predicated region body
PF: predicated region fallthrough
CT: control target
= control target key end

     0   :  { %vm82_vm0 = vcmask 1043456   ;;  %v1341_v2 = vmov 0   ;;  %s1342_s13 = smov 127   ;;  %vm78_vm1 = vcmask 64512   ;;  %vm194_vm2 = vcmask 1039360   ;;  %s1343_s18 = smov 1   ;;  %s1708_s0 = inlined_call_operand.vmem [shape: bf16[1,8,512], index: 0, kind: input, shape index: {}]   ;;  %s1709_s3 = inlined_call_operand.vmem [shape: bf16[3,16,8], index: 3, kind: input, shape index: {}]   ;;  %s1710_s4 = inlined_call_operand.vmem [shape: f32[16,1], index: 4, kind: input, shape index: {}]   ;;  %s1711_s1 = inlined_call_operand.vmem [shape: bf16[1,2,16,512], index: 1, kind: input, shape index: {}]   ;;  %s1712_s2 = inlined_call_operand.vmem [shape: f32[2,1,256], index: 2, kind: input, shape index: {}]   ;;  %s1713_s5 = inlined_call_operand.vmem [shape: bf16[3,8,32], index: 5, kind: input, shape index: {}]   ;;  %s1714_s6 = inlined_call_operand.vmem [shape: f32[8,1], index: 6, kind: input, shape index: {}]   ;;  %s1715_s7 = inlined_call_operand.vmem [shape: bf16[3,8,8], index: 7, kind: input, shape index: {}]   ;;  %s1716_s8 = inlined_call_operand.vmem [shape: f32[8,1], index: 8, kind: input, shape index: {}]   ;;  %s1717_s9 = inlined_call_operand.vmem [shape: f32[1,2,8,256], index: 9, kind: output, shape index: {}]  }
   0x1   :  { %v63_v0 = vld [vmem:[%s1708_s0 + $0x4] sm:$0xff]  ;;  %v1286_v1 = vld [vmem:[%s1708_s0 + $0xc] ss:$0 sps:$4 sm:$0xff]   ;;  %121 = vmatprep.mubr.bf16.mxu0 %v1341_v2  ;;  %238 = vmatprep.mubr.bf16.mxu1 %v1341_v2  ;;  %v1288_v9 = vld [vmem:[%s1709_s3 + $0x10] sm:$0xff]   ;;  %v137_v23 = vlaneseq  ;;  %vm421_vm8 = vcmask 261120   ;;  %vm412_vm10 = vcmask 7168  }
   0x2   :  { %v1197_v3 = vcombine.low %v63_v0, %v63_v0  ;;  %v1198_v4 = vcombine.high %v63_v0, %v63_v0  ;;  %1283 = vset.pattern.permute.xlu0 %v1341_v2  ;;  %1282 = vset.pattern.permute.xlu1 %v1341_v2  ;;  %v1287_v6 = vld [vmem:[%s1709_s3 + $0x8] sm:$0xff]   ;;  %v33_v7 = vld [vmem:[%s1710_s4] sm:$0xff]  ;;  %v167_v12 = vld [vmem:[%s1711_s1 + $0x10] sm:$0xff] }
   0x3   :  { %192 = vrot.lane.b32.xlu1 %v1286_v1, %s1342_s13  ;;  %v34_v8 = vld [vmem:[%s1710_s4 + $0x8] sm:$0xff]  ;;  %v165_v10 = vld [vmem:[%s1711_s1] sm:$0xff]  ;;  %v168_v13 = vld [vmem:[%s1711_s1 + $0x18] sm:$0xff]  ;;  %171 = vst [vmem:[#allocation2 + $0x30] sm:$0xff] %v167_v12  ;;  %v1456_v25 = vshrl.u32 %v137_v23, 7 }
   0x4   :  { %188 = vrot.lane.b32.xlu0 %v1197_v3, %s1342_s13  ;;  %1192 = vmatprep.subr.msk.bf16.mxu0 %vm82_vm0, %v1198_v4  ;;  %v84_v5 = vsel %vm82_vm0, %v1197_v3, 0  ;;  %v166_v11 = vld [vmem:[%s1711_s1 + $0x8] sm:$0xff]  ;;  %169 = vst [vmem:[#allocation2 + $0x20] sm:$0xff] %v165_v10  ;;  %172 = vst [vmem:[#allocation2 + $0x38] sm:$0xff] %v168_v13  ;;  %v1289_v22 = vld [vmem:[%s1709_s3] sm:$0xff]  }
   0x5   :  { %104 = vmatpush1.bf16.msra.mxu0 %v84_v5  ;;  %170 = vst [vmem:[#allocation2 + $0x28] sm:$0xff] %v166_v11  ;;  %v57_v24 = vld [vmem:[%s1712_s2] sm:$0x3]  ;;  %v139_v26 = vsub.s32 0, %v1456_v25  ;;  %v143_v28 = vsub.s32 1, %v1456_v25  ;;  %v1210_v30 = vld [vmem:[%s1711_s1 + $0x28] sm:$0xff] }
   0x6   :  { %1205 = vmatprep.subr.msk.bf16.mxu0 %vm82_vm0, %v1198_v4  ;;  %vm58_vm3 = vcmp.gt.f32.partialorder %v57_v24, 0.5  ;;  %v1212_v31 = vld [vmem:[%s1711_s1 + $0x38] sm:$0xff]  ;;  %346 = vst [vmem:[#allocation3 + $0x28] sm:$0xff] %v1210_v30  ;;  %v1209_v34 = vld [vmem:[%s1711_s1 + $0x20] sm:$0xff]  ;;  %v1211_v35 = vld [vmem:[%s1711_s1 + $0x30] sm:$0xff] }
   0x7   :  { %37 = vperm.xlu1 %1282, %v33_v7   ;;  %v136_v27 = vsel %vm58_vm3, 1, %v1341_v2  ;;  %348 = vst [vmem:[#allocation3 + $0x38] sm:$0xff] %v1212_v31  ;;  %345 = vst [vmem:[#allocation3 + $0x20] sm:$0xff] %v1209_v34  ;;  %v1217_v37 = vcombine.high %v1209_v34, %v1211_v35  ;;  %v1216_v47 = vcombine.low %v1209_v34, %v1211_v35  ;;  %v1220_v56 = vld [vmem:[%s1713_s5 + $0x4] sm:$0xf] }
   0x8   :  { %190 = vrot.lane.b32.xlu0 %v1198_v4, %s1342_s13  ;;  %1193 = vmatmul.mubr.msk.bf16.vlgmr.msra.gmra.mxu0 %vm78_vm1, %v1287_v6  ;;  %v1463_v29 = vrot.slane %v136_v27, %v139_v26  ;;  %v1475_v33 = vrot.slane %v136_v27, %v143_v28  ;;  %347 = vst [vmem:[#allocation3 + $0x30] sm:$0xff] %v1211_v35  ;;  %v617_v57 = vld [vmem:[%s1713_s5] sm:$0xf]  ;;  %v1301_v34 = vld [vmem:[#allocation2 + $0xc] ss:$16 sps:$4 sm:$0xff]  }
   0x9   :  { %279 = vmatpush1.bf16.msra.mxu0 %v84_v5  ;;  %296 = vmatprep.mubr.bf16.mxu0 %v1341_v2  ;;  %v1186_v58 = vld [vmem:[%s1712_s2 + $0x2] sm:$0x3] }
   0xa   :  { %vm145_vm4 = vcmp.eq.s32.totalorder %v1463_v29, 1  ;;  %vm146_vm5 = vcmp.eq.s32.totalorder %v1475_v33, 1  ;;  %vm61_vm9 = vcmp.gt.f32.partialorder %v1186_v58, 0.5  ;;  %v1299_v31 = vld [vmem:[#allocation3] ss:$16 sps:$4 sm:$0xff]  }
   0xb   :  { %v1438_v14 = vld [vmem:[#allocation2 + $0x24] ss:$16 sps:$4 sm:$0xff]   ;;  %408 = vrot.lane.b32.xlu1 %v1217_v37, %s1343_s18  ;;  %vm1311_vm6 = vmpackc.low %vm146_vm5, %vm146_vm5  ;;  %v311_v61 = vsel %vm61_vm9, 1, %v1341_v2 }
   0xc   :  { %42 = vperm.xlu0 %1283, %v34_v8   ;;  %v1440_v15 = vld [vmem:[#allocation2 + $0x28] ss:$16 sps:$4 sm:$0xff]   ;;  %vm1314_vm7 = vmpackc.low %vm145_vm4, %vm145_vm4  ;;  %v1538_v0 = vrot.slane %v311_v61, %v139_v26  ;;  %v1542_v1 = vrot.slane %v311_v61, %v143_v28 }
   0xd   :  { %505 = vmatprep.subr.bf16.mxu0 %v1440_v15  ;;  %v1226_v61 = vld [vmem:[%s1713_s5 + $0x8] sm:$0xf] }
   0xe   :  { %v1294_v44 = vld [vmem:[#allocation3 + $0x28] ss:$16 sps:$4 sm:$0xff]   ;;  %vm320_vm11 = vcmp.eq.s32.totalorder %v1538_v0, 1  ;;  %vm321_vm12 = vcmp.eq.s32.totalorder %v1542_v1, 1 }
   0xf   :  { %410 = vrot.lane.b32.xlu1 %v1294_v44, %s1343_s18  ;;  %vm1603_vm13 = vmpackc.low %vm321_vm12, %vm321_vm12 }
  0x10   :  { %1206 = vmatmul.mubr.msk.bf16.vlgmr.msra.gmra.mxu0 %vm78_vm1, %v1288_v9  ;;  %406 = vrot.lane.b32.xlu0 %v1216_v47, %s1343_s18  ;;  %v1304_v47 = vld [vmem:[#allocation3 + $0x28] ss:$16 sps:$4 sm:$0xff]   ;;  %vm1328_vm14 = vmpackc.low %vm320_vm11, %vm320_vm11 }
  0x11   :  { %525 = vmatprep.mubr.bf16.mxu0 %v1341_v2  ;;  %506 = vmatpush1.bf16.msra.mxu0 %v1438_v14 }
  0x75   :  { %v193_v17 = vpop.permute.xlu1 %192 }
  0x76   :  { %v189_v16 = vpop.permute.xlu0 %188 }
  0x7a   :  { %v191_v18 = vpop.permute.xlu0 %190 }
  0x7b   :  { %v196_v19 = vsel %vm194_vm2, %v191_v18, %v193_v17  ;;  %v195_v20 = vsel %vm194_vm2, %v189_v16, %v191_v18 }
  0x7c   :  { %1200 = vmatprep.subr.msk.bf16.mxu1 %vm82_vm0, %v196_v19  ;;  %v201_v21 = vsel %vm82_vm0, %v195_v20, 0 }
  0x7d   :  { %221 = vmatpush1.bf16.msra.mxu1 %v201_v21 }
  0x80   :  { %1201 = vmatmul.mubr.msk.bf16.vlgmr.msra.gmra.mxu1 %vm78_vm1, %v1289_v22 }
  0x81   :  { %457 = vmatprep.mubr.bf16.mxu1 %v1341_v2 }
  0x82   :  { %v1471_v32 = vpop.permute.xlu1 %37 }
  0x86   :  { %v409_v60 = vpop.permute.xlu1 %408 }
  0x87   :  { %v1485_v40 = vpop.permute.xlu0 %42 }
  0x8a   :  { %v411_v3 = vpop.permute.xlu1 %410 }
  0x8b   :  { %v407_v5 = vpop.permute.xlu0 %406  ;;  %v416_v6 = vsel %vm412_vm10, %v409_v60, %v411_v3  ;;  %v1236_v3 = vld [vmem:[%s1713_s5 + $0x8] sm:$0xf] }
  0x8c   :  { %v415_v8 = vsel %vm412_vm10, %v407_v5, %v409_v60  ;;  %437 = vmatprep.subr.bf16.mxu1 %v416_v6 }
  0x8d   :  { %438 = vmatpush1.bf16.msra.mxu1 %v415_v8 }
  0xc8   :  { %v123_v36 = vpop.f32.mrf.mxu0 }
  0xc9   :  { %v132_v38 = vadd.f32 %v123_v36, %v1471_v32 }
  0xca   :  { %v125_v39 = vpop.f32.mrf.mxu0 }
  0xcb   :  { %v133_v41 = vadd.f32 %v125_v39, %v1471_v32  ;;  %v1492_v42 = vsel %vm145_vm4, %v132_v38, 0.0 }
  0xcc   :  { %v127_v43 = vpop.f32.mrf.mxu0 }
  0xcd   :  { %v134_v45 = vadd.f32 %v127_v43, %v1485_v40  ;;  %v1497_v46 = vsel %vm146_vm5, %v133_v41, 0.0 }
  0xce   :  { %v129_v48 = vpop.f32.mrf.mxu0 }
  0xcf   :  { %v135_v49 = vadd.f32 %v129_v48, %v1485_v40  ;;  %v1503_v50 = vsel %vm145_vm4, %v134_v45, 0.0  ;;  %v1315_v55 = vpack.c.bf16 %v134_v45, %v132_v38 }
  0xd0   :  { %v1309_v52 = vpack.c.bf16 %v1503_v50, %v1492_v42  ;;  %v298_v59 = vpop.f32.mrf.mxu0  ;;  %v1302_v50 = vld [vmem:[#allocation3 + $0x24] ss:$16 sps:$4 sm:$0xff]  }
  0xd1   :  { %v1508_v51 = vsel %vm146_vm5, %v135_v49, 0.0  ;;  %v1312_v54 = vpack.c.bf16 %v135_v49, %v133_v41  ;;  %v373_v49 = vld [vmem:[%s1713_s5] sm:$0xf] }
  0xd2   :  { %v1310_v53 = vpack.c.bf16 %v1508_v51, %v1497_v46  ;;  %v300_v62 = vpop.f32.mrf.mxu0 }
  0xd3   :  { %1313 = vmatprep.subr.msk.bf16.mxu0 %vm1311_vm6, %v1312_v54 }
  0xd4   :  { %1316 = vmatpush1.bf16.msk.msra.mxu0 %vm1314_vm7, %v1315_v55  ;;  %v302_v11 = vpop.f32.mrf.mxu0 }
  0xd5   :  { %633 = vmatprep.subr.bf16.mxu0 %v1440_v15 }
  0xd6   :  { %v304_v23 = vpop.f32.mrf.mxu0 }
  0xd7   :  { %1225 = vmatmul.mubr.msk.bf16.vlgmr.msra.gmra.mxu0 %vm421_vm8, %v1220_v56 }
  0xd8   :  { %634 = vmatpush1.bf16.msra.mxu0 %v1438_v14  ;;  %653 = vmatprep.mubr.bf16.mxu0 %v1341_v2 }
  0xd9   :  { %1319 = vmatprep.subr.msk.bf16.mxu0 %vm1311_vm6, %v1312_v54 }
  0xdc   :  { %1322 = vmatpush1.bf16.msk.msra.mxu0 %vm1314_vm7, %v1315_v55 }
  0xdf   :  { %1233 = vmatmul.mubr.msk.bf16.vlgmr.msra.gmra.mxu0 %vm421_vm8, %v617_v57 }
  0xe0   :  { %793 = vmatprep.mubr.bf16.mxu0 %v1341_v2 }
 0x140   :  { %v240_v63 = vpop.f32.mrf.mxu1 }
 0x141   :  { %v249_v4 = vadd.f32 %v240_v63, %v1471_v32 }
 0x142   :  { %v242_v7 = vpop.f32.mrf.mxu1 }
 0x143   :  { %v1547_v9 = vadd.f32 %v298_v59, %v249_v4  ;;  %v250_v10 = vadd.f32 %v242_v7, %v1471_v32  ;;  %v1300_v32 = vld [vmem:[#allocation2 + $0x2c] ss:$16 sps:$4 sm:$0xff]   ;;  %v1234_v4 = vld [vmem:[%s1713_s5 + $0x4] sm:$0xf] }
 0x144   :  { %v244_v12 = vpop.f32.mrf.mxu1 }
 0x145   :  { %v308_v13 = vadd.f32 %v300_v62, %v250_v10  ;;  %v251_v16 = vadd.f32 %v244_v12, %v1485_v40  ;;  %v322_v18 = vsel %vm320_vm11, %v1547_v9, 0.0 }
 0x146   :  { %v246_v17 = vpop.f32.mrf.mxu1 }
 0x147   :  { %v323_v19 = vsel %vm321_vm12, %v308_v13, 0.0  ;;  %v1558_v20 = vadd.f32 %v302_v11, %v251_v16  ;;  %v252_v21 = vadd.f32 %v246_v17, %v1485_v40 }
 0x148   :  { %v1275_v22 = vpack.c.bf16 %v323_v19, %v322_v18 }
 0x149   :  { %v310_v24 = vadd.f32 %v304_v23, %v252_v21  ;;  %v324_v25 = vsel %vm320_vm11, %v1558_v20, 0.0  ;;  %v1329_v60 = vpack.c.bf16 %v1558_v20, %v1547_v9 }
 0x14a   :  { %338 = vst [vmem:[#allocation3 + $0x4] sm:$0xff] %v1275_v22 }
 0x14b   :  { %v325_v26 = vsel %vm321_vm12, %v310_v24, 0.0  ;;  %v1326_v56 = vpack.c.bf16 %v310_v24, %v308_v13 }
 0x14c   :  { %v1276_v27 = vpack.c.bf16 %v325_v26, %v324_v25 }
 0x14e   :  { %339 = vst [vmem:[#allocation3 + $0x14] sm:$0xff] %v1276_v27 }
 0x155   :  { %v1296_v28 = vld [vmem:[#allocation3 + $0x8] ss:$16 sps:$4 sm:$0xff]   ;;  %v1297_v30 = vld [vmem:[#allocation3 + $0x4] ss:$16 sps:$4 sm:$0xff]  }
 0x156   :  { %404 = vrot.lane.b32.xlu0 %v1296_v28, %s1343_s18  ;;  %402 = vrot.lane.b32.xlu1 %v1297_v30, %s1343_s18 }
 0x15a   :  { %746 = vrot.lane.b32.xlu0 %v1440_v15, %s1342_s13  ;;  %400 = vrot.lane.b32.xlu1 %v1299_v31, %s1343_s18  ;;  %v45_v15 = vld [vmem:[%s1714_s6] sm:$0xff] }
 0x15e   :  { %744 = vrot.lane.b32.xlu0 %v1438_v14, %s1342_s13  ;;  %748 = vrot.lane.b32.xlu1 %v1300_v32, %s1342_s13 }
 0x162   :  { %742 = vrot.lane.b32.xlu0 %v1301_v34, %s1342_s13  ;;  %740 = vrot.lane.b32.xlu1 %v1310_v53, %s1342_s13 }
 0x166   :  { %48 = vperm.xlu0 %1283, %v45_v15   ;;  %738 = vrot.lane.b32.xlu1 %v1309_v52, %s1342_s13 }
 0x197   :  { %v527_v14 = vpop.f32.mrf.mxu0 }
 0x199   :  { %v1586_v35 = vpop.f32.mrf.mxu0 }
 0x19b   :  { %v531_v36 = vpop.f32.mrf.mxu0 }
 0x19d   :  { %v532_v37 = vpop.f32.mrf.mxu0 }
 0x19f   :  { %v1588_v38 = vpop.f32.mrf.mxu0 }
 0x1a1   :  { %v1590_v39 = vpop.f32.mrf.mxu0 }
 0x1a3   :  { %v659_v40 = vpop.f32.mrf.mxu0 }
 0x1a5   :  { %v660_v41 = vpop.f32.mrf.mxu0 }
 0x1c8   :  { %v405_v43 = vpop.permute.xlu0 %404  ;;  %v403_v44 = vpop.permute.xlu1 %402 }
 0x1c9   :  { %v414_v45 = vsel %vm412_vm10, %v403_v44, %v405_v43 }
 0x1ca   :  { %439 = vmatprep.subr.bf16.mxu1 %v414_v45 }
 0x1cc   :  { %v747_v46 = vpop.permute.xlu0 %746  ;;  %v401_v42 = vpop.permute.xlu1 %400 }
 0x1cd   :  { %v413_v48 = vsel %vm412_vm10, %v401_v42, %v403_v44  ;;  %v1014_v42 = vld [vmem:[%s1715_s7] sm:$0xf] }
 0x1ce   :  { %440 = vmatpush1.bf16.msra.mxu1 %v413_v48 }
 0x1cf   :  { %573 = vmatprep.subr.bf16.mxu1 %v1304_v47 }
 0x1d0   :  { %v745_v51 = vpop.permute.xlu0 %744  ;;  %v749_v53 = vpop.permute.xlu1 %748 }
 0x1d1   :  { %v752_v52 = vsel %vm194_vm2, %v745_v51, %v747_v46  ;;  %1219 = vmatmul.mubr.msk.bf16.vlgmr.msra.gmra.mxu1 %vm421_vm8, %v373_v49  ;;  %v753_v54 = vsel %vm194_vm2, %v747_v46, %v749_v53  ;;  %v51_v51 = vld [vmem:[%s1716_s8] sm:$0xff] }
 0x1d2   :  { %574 = vmatpush1.bf16.msra.mxu1 %v1302_v50  ;;  %773 = vmatprep.subr.bf16.mxu0 %v753_v54 }
 0x1d3   :  { %1327 = vmatprep.subr.msk.bf16.mxu1 %vm1603_vm13, %v1326_v56  ;;  %774 = vmatpush1.bf16.msra.mxu0 %v752_v52 }
 0x1d4   :  { %v743_v57 = vpop.permute.xlu0 %742  ;;  %v741_v58 = vpop.permute.xlu1 %740  ;;  %593 = vmatprep.mubr.bf16.mxu1 %v1341_v2 }
 0x1d5   :  { %v751_v59 = vsel %vm194_vm2, %v741_v58, %v743_v57 }
 0x1d6   :  { %1330 = vmatpush1.bf16.msk.msra.mxu1 %vm1328_vm14, %v1329_v60  ;;  %775 = vmatprep.subr.bf16.mxu0 %v751_v59 }
 0x1d7   :  { %680 = vmatprep.subr.bf16.mxu1 %v1304_v47 }
 0x1d8   :  { %v739_v62 = vpop.permute.xlu1 %738 }
 0x1d9   :  { %v750_v63 = vsel %vm194_vm2, %v739_v62, %v741_v58  ;;  %1231 = vmatmul.mubr.msk.bf16.vlgmr.msra.gmra.mxu1 %vm421_vm8, %v1226_v61  ;;  %v823_v61 = vld [vmem:[%s1715_s7] sm:$0xf] }
 0x1da   :  { %681 = vmatpush1.bf16.msra.mxu1 %v1302_v50  ;;  %776 = vmatpush1.bf16.msra.mxu0 %v750_v63  ;;  %v1308_v50 = vld [vmem:[#allocation4 + $0xc] ss:$0 sps:$4 sm:$0xff]  }
 0x1db   :  { %1333 = vmatprep.subr.msk.bf16.mxu1 %vm1603_vm13, %v1326_v56  ;;  %700 = vmatprep.mubr.bf16.mxu1 %v1341_v2 }
 0x1dd   :  { %1243 = vmatmul.mubr.msk.bf16.vlgmr.msra.gmra.mxu0 %vm421_vm8, %v1236_v3 }
 0x1de   :  { %1336 = vmatpush1.bf16.msk.msra.mxu1 %vm1328_vm14, %v1329_v60  ;;  %940 = vmatprep.mubr.bf16.mxu0 %v1341_v2 }
 0x1e1   :  { %1235 = vmatmul.mubr.msk.bf16.vlgmr.msra.gmra.mxu1 %vm421_vm8, %v1234_v4  ;;  %v49_v6 = vpop.permute.xlu0 %48 }
 0x1e2   :  { %881 = vmatprep.mubr.bf16.mxu1 %v1341_v2  ;;  %v662_v28 = vadd.f32 %v1588_v38, %v49_v6  ;;  %v663_v32 = vadd.f32 %v1590_v39, %v49_v6  ;;  %v1250_v38 = vld [vmem:[%s1715_s7 + $0x4] sm:$0xf] }
 0x291   :  { %v459_v5 = vpop.f32.mrf.mxu1 }
 0x292   :  { %v466_v8 = vadd.f32 %v459_v5, %v49_v6 }
 0x293   :  { %v461_v7 = vpop.f32.mrf.mxu1 }
 0x294   :  { %v467_v10 = vadd.f32 %v461_v7, %v49_v6  ;;  %v534_v12 = vadd.f32 %v527_v14, %v466_v8  ;;  %v1265_v7 = vld [vmem:[%s1715_s7 + $0x8] sm:$0xf] }
 0x295   :  { %v463_v9 = vpop.f32.mrf.mxu1  ;;  %v1255_v8 = vld [vmem:[%s1715_s7 + $0x8] sm:$0xf] }
 0x296   :  { %v535_v17 = vadd.f32 %v1586_v35, %v467_v10  ;;  %v1262_v9 = vld [vmem:[%s1715_s7 + $0x4] sm:$0xf] }
 0x297   :  { %v464_v11 = vpop.f32.mrf.mxu1 }
 0x299   :  { %v595_v13 = vpop.f32.mrf.mxu1 }
 0x29a   :  { %v602_v16 = vadd.f32 %v595_v13, %v534_v12 }
 0x29b   :  { %v597_v18 = vpop.f32.mrf.mxu1 }
 0x29c   :  { %v604_v19 = vmax.f32 %v602_v16, 0.0  ;;  %v603_v20 = vadd.f32 %v597_v18, %v535_v17 }
 0x29d   :  { %v599_v21 = vpop.f32.mrf.mxu1  ;;  %v795_v22 = vpop.f32.mrf.mxu0 }
 0x29e   :  { %v605_v23 = vmax.f32 %v603_v20, 0.0  ;;  %v606_v26 = vsel %vm145_vm4, %v604_v19, 0.0 }
 0x29f   :  { %v600_v24 = vpop.f32.mrf.mxu1  ;;  %v797_v25 = vpop.f32.mrf.mxu0  ;;  %v1338_v36 = vpack.c.bf16 %v606_v26, %v606_v26 }
 0x2a0   :  { %v607_v27 = vsel %vm146_vm5, %v605_v23, 0.0 }
 0x2a1   :  { %v702_v30 = vpop.f32.mrf.mxu1  ;;  %v799_v31 = vpop.f32.mrf.mxu0  ;;  %v1337_v35 = vpack.c.bf16 %v607_v27, %v607_v27  ;;  %v903_v29 = vsel %vm82_vm0, %v1338_v36, 0 }
 0x2a2   :  { %v709_v34 = vadd.f32 %v702_v30, %v662_v28 }
 0x2a3   :  { %v704_v15 = vpop.f32.mrf.mxu1  ;;  %v800_v14 = vpop.f32.mrf.mxu0  ;;  %1253 = vmatprep.subr.msk.bf16.mxu0 %vm82_vm0, %v1337_v35 }
 0x2a4   :  { %v802_v37 = vadd.f32 %v795_v22, %v709_v34  ;;  %v710_v40 = vadd.f32 %v704_v15, %v663_v32  ;;  %923 = vmatpush1.bf16.msra.mxu0 %v903_v29 }
 0x2a5   :  { %v706_v41 = vpop.f32.mrf.mxu1  ;;  %1260 = vmatprep.subr.msk.bf16.mxu0 %vm82_vm0, %v1337_v35 }
 0x2a6   :  { %v804_v33 = vmax.f32 %v802_v37, 0.0  ;;  %v803_v43 = vadd.f32 %v797_v25, %v710_v40 }
 0x2a7   :  { %v707_v39 = vpop.f32.mrf.mxu1  ;;  %1254 = vmatmul.mubr.msk.bf16.vlgmr.msra.gmra.mxu0 %vm78_vm1, %v1250_v38 }
 0x2a8   :  { %v805_v44 = vmax.f32 %v803_v43, 0.0  ;;  %v806_v45 = vsel %vm320_vm11, %v804_v33, 0.0  ;;  %1033 = vmatpush1.bf16.msra.mxu0 %v903_v29  ;;  %1050 = vmatprep.mubr.bf16.mxu0 %v1341_v2 }
 0x2a9   :  { %v1340_v60 = vpack.c.bf16 %v806_v45, %v806_v45 }
 0x2aa   :  { %v807_v46 = vsel %vm321_vm12, %v805_v44, 0.0 }
 0x2ab   :  { %v1278_v47 = vpack.c.bf16 %v807_v46, %v806_v45  ;;  %v1339_v59 = vpack.c.bf16 %v807_v46, %v807_v46  ;;  %v962_v6 = vsel %vm82_vm0, %v1340_v60, 0 }
 0x2ad   :  { %816 = vst [vmem:[#allocation5 + $0x4] sm:$0xff] %v1278_v47 }
 0x2af   :  { %1261 = vmatmul.mubr.msk.bf16.vlgmr.msra.gmra.mxu0 %vm78_vm1, %v1014_v42 }
 0x2b0   :  { %1166 = vmatprep.mubr.bf16.mxu0 %v1341_v2 }
 0x2b4   :  { %v817_v48 = vld [vmem:[#allocation5] sm:$0xff]  ;;  %v1307_v1 = vld [vmem:[#allocation5 + $0x8] ss:$0 sps:$4 sm:$0xff]  }
 0x2b5   :  { %v1246_v49 = vcombine.high %v817_v48, %v817_v48  ;;  %v1245_v0 = vcombine.low %v817_v48, %v817_v48 }
 0x2b7   :  { %834 = vrot.lane.b32.xlu0 %v1246_v49, %s1343_s18  ;;  %832 = vrot.lane.b32.xlu1 %v1245_v0, %s1343_s18 }
 0x2bb   :  { %1117 = vrot.lane.b32.xlu0 %v1338_v36, %s1342_s13  ;;  %836 = vrot.lane.b32.xlu1 %v1307_v1, %s1343_s18 }
 0x2bf   :  { %1121 = vrot.lane.b32.xlu0 %v1308_v50, %s1342_s13  ;;  %1119 = vrot.lane.b32.xlu1 %v1337_v35, %s1342_s13 }
 0x2c3   :  { %54 = vperm.xlu1 %1282, %v51_v51  }
 0x329   :  { %v835_v52 = vpop.permute.xlu0 %834  ;;  %v833_v53 = vpop.permute.xlu1 %832 }
 0x32a   :  { %v838_v54 = vsel %vm412_vm10, %v833_v53, %v835_v52 }
 0x32b   :  { %v844_v58 = vsel %vm82_vm0, %v838_v54, 0 }
 0x32d   :  { %v1118_v55 = vpop.permute.xlu0 %1117  ;;  %v837_v56 = vpop.permute.xlu1 %836 }
 0x32e   :  { %v839_v57 = vsel %vm412_vm10, %v835_v52, %v837_v56 }
 0x32f   :  { %1248 = vmatprep.subr.msk.bf16.mxu1 %vm82_vm0, %v839_v57 }
 0x330   :  { %864 = vmatpush1.bf16.msra.mxu1 %v844_v58 }
 0x331   :  { %v1122_v62 = vpop.permute.xlu0 %1121  ;;  %1258 = vmatprep.subr.msk.bf16.mxu1 %vm82_vm0, %v1339_v59  ;;  %v1120_v63 = vpop.permute.xlu1 %1119 }
 0x332   :  { %v1123_v3 = vsel %vm194_vm2, %v1118_v55, %v1120_v63  ;;  %v1124_v4 = vsel %vm194_vm2, %v1120_v63, %v1122_v62 }
 0x333   :  { %v1129_v5 = vsel %vm82_vm0, %v1123_v3, 0  ;;  %1249 = vmatmul.mubr.msk.bf16.vlgmr.msra.gmra.mxu1 %vm78_vm1, %v823_v61  ;;  %1269 = vmatprep.subr.msk.bf16.mxu0 %vm82_vm0, %v1124_v4 }
 0x334   :  { %982 = vmatpush1.bf16.msra.mxu1 %v962_v6  ;;  %1149 = vmatpush1.bf16.msra.mxu0 %v1129_v5 }
 0x335   :  { %1263 = vmatprep.subr.msk.bf16.mxu1 %vm82_vm0, %v1339_v59  ;;  %999 = vmatprep.mubr.bf16.mxu1 %v1341_v2 }
 0x337   :  { %1270 = vmatmul.mubr.msk.bf16.vlgmr.msra.gmra.mxu0 %vm78_vm1, %v1265_v7 }
 0x33b   :  { %1259 = vmatmul.mubr.msk.bf16.vlgmr.msra.gmra.mxu1 %vm78_vm1, %v1255_v8 }
 0x33c   :  { %1080 = vmatpush1.bf16.msra.mxu1 %v962_v6  ;;  %1097 = vmatprep.mubr.bf16.mxu1 %v1341_v2 }
 0x33e   :  { %v55_v21 = vpop.permute.xlu1 %54 }
 0x343   :  { %1264 = vmatmul.mubr.msk.bf16.vlgmr.msra.gmra.mxu1 %vm78_vm1, %v1262_v9 }
 0x367   :  { %v942_v10 = vpop.f32.mrf.mxu0 }
 0x369   :  { %v944_v11 = vpop.f32.mrf.mxu0 }
 0x36b   :  { %v946_v12 = vpop.f32.mrf.mxu0 }
 0x36d   :  { %v947_v13 = vpop.f32.mrf.mxu0 }
 0x36f   :  { %v1052_v16 = vpop.f32.mrf.mxu0 }
 0x370   :  { %v1059_v29 = vadd.f32 %v1052_v16, %v55_v21 }
 0x371   :  { %v1054_v17 = vpop.f32.mrf.mxu0 }
 0x372   :  { %v1060_v43 = vadd.f32 %v1054_v17, %v55_v21 }
 0x373   :  { %v1056_v18 = vpop.f32.mrf.mxu0 }
 0x375   :  { %v1057_v19 = vpop.f32.mrf.mxu0 }
 0x3f3   :  { %v883_v20 = vpop.f32.mrf.mxu1 }
 0x3f4   :  { %v890_v23 = vadd.f32 %v883_v20, %v55_v21 }
 0x3f5   :  { %v885_v22 = vpop.f32.mrf.mxu1 }
 0x3f6   :  { %v891_v25 = vadd.f32 %v885_v22, %v55_v21  ;;  %v949_v28 = vadd.f32 %v942_v10, %v890_v23 }
 0x3f7   :  { %v887_v24 = vpop.f32.mrf.mxu1  ;;  %v1168_v2 = vpop.f32.mrf.mxu0 }
 0x3f8   :  { %v950_v34 = vadd.f32 %v944_v11, %v891_v25 }
 0x3f9   :  { %v888_v26 = vpop.f32.mrf.mxu1  ;;  %v1170_v27 = vpop.f32.mrf.mxu0 }
 0x3fb   :  { %v1001_v30 = vpop.f32.mrf.mxu1  ;;  %v1172_v31 = vpop.f32.mrf.mxu0 }
 0x3fc   :  { %v1008_v32 = vadd.f32 %v1001_v30, %v949_v28 }
 0x3fd   :  { %v1003_v15 = vpop.f32.mrf.mxu1  ;;  %v1173_v14 = vpop.f32.mrf.mxu0 }
 0x3fe   :  { %v1010_v35 = vmax.f32 %v1008_v32, 0.0  ;;  %v1009_v36 = vadd.f32 %v1003_v15, %v950_v34 }
 0x3ff   :  { %v1005_v37 = vpop.f32.mrf.mxu1 }
 0x400   :  { %1012 = vst [vmem:[%s1717_s9] sm:$0xff] %v1010_v35  ;;  %v1011_v40 = vmax.f32 %v1009_v36, 0.0 }
 0x401   :  { %v1006_v41 = vpop.f32.mrf.mxu1 }
 0x402   :  { %1013 = vst [vmem:[%s1717_s9 + $0x8] sm:$0xff] %v1011_v40 }
 0x403   :  { %v1099_v33 = vpop.f32.mrf.mxu1 }
 0x404   :  { %v1106_v38 = vadd.f32 %v1099_v33, %v1059_v29 }
 0x405   :  { %v1101_v39 = vpop.f32.mrf.mxu1 }
 0x406   :  { %v1175_v44 = vadd.f32 %v1168_v2, %v1106_v38  ;;  %v1107_v45 = vadd.f32 %v1101_v39, %v1060_v43 }
 0x407   :  { %v1103_v46 = vpop.f32.mrf.mxu1 }
 0x408   :  { %v1177_v47 = vmax.f32 %v1175_v44, 0.0  ;;  %v1176_v42 = vadd.f32 %v1170_v27, %v1107_v45 }
 0x409   :  { %v1104_v48 = vpop.f32.mrf.mxu1 }
 0x40a   :  { %1271 = vst [vmem:[%s1717_s9 + $0x10] sm:$0xff] %v1177_v47  ;;  %v1178_v49 = vmax.f32 %v1176_v42, 0.0 }
 0x40c   :  { %1272 = vst [vmem:[%s1717_s9 + $0x18] sm:$0xff] %v1178_v49 }

</bundles_post_ra>
